<compile_context>
chip_gen: v7x
topology: tpu7x:2x2x1
jax: 0.10.0
libtpu: 0.0.40
codegen_flags: <defaults>
</compile_context>

<pallas_src>
import functools

import jax
import jax.numpy as jnp
from jax.experimental import pallas as pl
from jax.experimental.pallas import tpu as pltpu

LANE = 128          # lane (last-dim) tile
SUBLANE_BF16 = 16   # bf16 sublane tile -> batch tile must be a multiple of this


def _round_up(x, m):
    return (x + m - 1) // m * m


def _mlp_kernel(num_layers, compute_dtype, *refs):
    """Fused MLP forward on one batch tile.

    refs = (x_ref, w0_ref, b0_ref, w1_ref, b1_ref, ..., out_ref)
    Linear + ReLU for all but the last layer; the last layer is Linear only
    (matches `model_layers = model_layers[:-1]`, which drops the trailing ReLU).
    """
    x_ref = refs[0]
    out_ref = refs[-1]
    param_refs = refs[1:-1]

    h = x_ref[...]
    for layer in range(num_layers):
        w = param_refs[2 * layer][...]
        b = param_refs[2 * layer + 1][...]
        # bf16 x bf16 -> f32 accumulate on the MXU; bias-add in f32 on the VPU.
        h = jnp.dot(h.astype(compute_dtype), w.astype(compute_dtype),
                    preferred_element_type=jnp.float32) + b
        if layer != num_layers - 1:
            h = jnp.maximum(h, 0.0)  # ReLU
    out_ref[...] = h.astype(out_ref.dtype)


@functools.partial(jax.jit, static_argnames=("tile_m", "compute_dtype"))
def fpl_forward(x, weights, biases, *, tile_m=512, compute_dtype=jnp.bfloat16):
    """Run the fused MLP kernel.

    x:        (B, layer_dims[0]) float32
    weights:  list of (dim_in, dim_out) float32   (transposed vs. PyTorch's (out, in))
    biases:   list of (dim_out,)  float32
    """
    num_layers = len(weights)
    B, d_in = x.shape
    d_out = weights[-1].shape[1]

    # ---- host-side padding: lanes to 128, batch to the chosen tile ----------
    dims = [w.shape[0] for w in weights] + [d_out]
    pdims = [_round_up(d, LANE) for d in dims]

    tm = min(_round_up(B, SUBLANE_BF16), _round_up(tile_m, SUBLANE_BF16))
    B_pad = _round_up(B, tm)

    # padded input tile is stored directly in the matmul compute dtype (halves its DMA bytes)
    x_p = jnp.zeros((B_pad, pdims[0]), compute_dtype).at[:B, :d_in].set(
        x.astype(compute_dtype))

    w_p, b_p = [], []
    for i, (w, b) in enumerate(zip(weights, biases)):
        wp = jnp.zeros((pdims[i], pdims[i + 1]), compute_dtype)
        wp = wp.at[: w.shape[0], : w.shape[1]].set(w.astype(compute_dtype))
        bp = jnp.zeros((1, pdims[i + 1]), jnp.float32)
        bp = bp.at[0, : b.shape[0]].set(b.astype(jnp.float32))
        w_p.append(wp)
        b_p.append(bp)

    grid = (B_pad // tm,)

    # x / out tiled along batch; weights & biases full-array, same block each step.
    in_specs = [pl.BlockSpec((tm, pdims[0]), lambda i: (i, 0))]
    for wp, bp in zip(w_p, b_p):
        in_specs.append(pl.BlockSpec(wp.shape, lambda i: (0, 0)))
        in_specs.append(pl.BlockSpec(bp.shape, lambda i: (0, 0)))
    out_spec = pl.BlockSpec((tm, pdims[-1]), lambda i: (i, 0))

    # VMEM budget: double-buffered params + double-buffered activation tiles (+ headroom).
    resident = 2 * sum(a.size * a.dtype.itemsize for a in w_p + b_p)
    resident += 2 * tm * pdims[0] * jnp.dtype(compute_dtype).itemsize      # input tiles
    resident += 2 * tm * pdims[-1] * jnp.dtype(jnp.float32).itemsize       # output tiles
    vmem_limit = int(min(max(2 * resident + (8 << 20), 32 << 20), 64 << 20))

    kernel = functools.partial(_mlp_kernel, num_layers, compute_dtype)

    fn = pl.pallas_call(
        kernel,
        out_shape=jax.ShapeDtypeStruct((B_pad, pdims[-1]), jnp.float32),
        grid_spec=pltpu.PrefetchScalarGridSpec(
            num_scalar_prefetch=0,
            grid=grid,
            in_specs=in_specs,
            out_specs=out_spec,
        ),
        compiler_params=pltpu.CompilerParams(
            dimension_semantics=("parallel",),
            vmem_limit_bytes=vmem_limit,
        ),
    )

    args = [x_p]
    for wp, bp in zip(w_p, b_p):
        args.append(wp)
        args.append(bp)
    out_pad = fn(*args)
    return out_pad[:B, :d_out]


def init_params(key, layer_dims):
    """Deterministic init mimicking nn.Linear's default (uniform in +-1/sqrt(fan_in))."""
    weights, biases = [], []
    for dim_in, dim_out in zip(layer_dims[:-1], layer_dims[1:]):
        key, kw, kb = jax.random.split(key, 3)
        bound = 1.0 / jnp.sqrt(dim_in)
        # stored as (dim_in, dim_out) == PyTorch weight.T
        w = jax.random.uniform(kw, (dim_in, dim_out), jnp.float32, -bound, bound)
        b = jax.random.uniform(kb, (dim_out,), jnp.float32, -bound, bound)
        weights.append(w)
        biases.append(b)
    return weights, biases


def reference_forward(x, weights, biases, compute_dtype=jnp.bfloat16):
    """Pure-JAX reference using the same bf16-operand / f32-accumulate recipe as the kernel."""
    h = x
    n = len(weights)
    for i, (w, b) in enumerate(zip(weights, biases)):
        h = jnp.dot(h.astype(compute_dtype), w.astype(compute_dtype),
                    preferred_element_type=jnp.float32) + b.reshape(1, -1)
        if i != n - 1:
            h = jnp.maximum(h, 0.0)
    return h


if __name__ == "__main__":
    key = jax.random.PRNGKey(0)
    layer_dims = [32, 64, 64, 8]   # FPLModel(layer_dims)
    batch = 8

    kx, kp = jax.random.split(key)
    x = jax.random.normal(kx, (batch, layer_dims[0]), jnp.float32)
    weights, biases = init_params(kp, layer_dims)

    out = fpl_forward(x, weights, biases)
    out = jax.block_until_ready(out)

    ref = reference_forward(x, weights, biases)
    assert out.shape == (batch, layer_dims[-1])
    assert jnp.allclose(out, ref, atol=2e-3, rtol=2e-3), "mismatch vs pure-JAX reference"

    print("KERNEL_OK")
</pallas_src>

<mosaic_0001>
module attributes {stable_mosaic.version = 11 : i64} {
  func.func @_mlp_kernel(%arg0: i32, %arg1: memref<16x128xbf16, #tpu.memory_space<vmem>>, %arg2: memref<128x128xbf16, #tpu.memory_space<vmem>>, %arg3: memref<1x128xf32, #tpu.memory_space<vmem>>, %arg4: memref<128x128xbf16, #tpu.memory_space<vmem>>, %arg5: memref<1x128xf32, #tpu.memory_space<vmem>>, %arg6: memref<128x128xbf16, #tpu.memory_space<vmem>>, %arg7: memref<1x128xf32, #tpu.memory_space<vmem>>, %arg8: memref<16x128xf32, #tpu.memory_space<vmem>>) attributes {dimension_semantics = [#tpu.dimension_semantics<parallel>], iteration_bounds = array<i64: 1>, scalar_prefetch = 0 : i64, scratch_operands = 0 : i64, tpu.core_type = #tpu.core_type<tc>, window_params = [{transform_indices = @transform_0, window_bounds = array<i64: 16, 128>}, {pipeline_mode = #tpu.pipeline_mode<synchronous>, transform_indices = @transform_1, window_bounds = array<i64: 128, 128>}, {pipeline_mode = #tpu.pipeline_mode<synchronous>, transform_indices = @transform_2, window_bounds = array<i64: 1, 128>}, {pipeline_mode = #tpu.pipeline_mode<synchronous>, transform_indices = @transform_3, window_bounds = array<i64: 128, 128>}, {pipeline_mode = #tpu.pipeline_mode<synchronous>, transform_indices = @transform_4, window_bounds = array<i64: 1, 128>}, {pipeline_mode = #tpu.pipeline_mode<synchronous>, transform_indices = @transform_5, window_bounds = array<i64: 128, 128>}, {pipeline_mode = #tpu.pipeline_mode<synchronous>, transform_indices = @transform_6, window_bounds = array<i64: 1, 128>}, {transform_indices = @transform_7, window_bounds = array<i64: 16, 128>}]} {
    %c0 = arith.constant 0 : index
    %c0_0 = arith.constant 0 : index
    %0 = vector.load %arg1[%c0, %c0_0] : memref<16x128xbf16, #tpu.memory_space<vmem>>, vector<16x128xbf16>
    %c0_1 = arith.constant 0 : index
    %c0_2 = arith.constant 0 : index
    %1 = vector.load %arg2[%c0_1, %c0_2] : memref<128x128xbf16, #tpu.memory_space<vmem>>, vector<128x128xbf16>
    %c0_3 = arith.constant 0 : index
    %c0_4 = arith.constant 0 : index
    %2 = vector.load %arg3[%c0_3, %c0_4] : memref<1x128xf32, #tpu.memory_space<vmem>>, vector<1x128xf32>
    %cst = arith.constant dense<0.000000e+00> : vector<16x128xf32>
    %3 = tpu.matmul %0, %1, %cst {dimension_numbers = #tpu.dot_dimension_numbers<[1], [0], [0], [1], [0, 0, 1, 1], [], []>} : vector<16x128xbf16>, vector<128x128xbf16>, vector<16x128xf32> -> vector<16x128xf32>
    %4 = vector.broadcast %2 : vector<1x128xf32> to vector<16x128xf32>
    %5 = arith.addf %3, %4 : vector<16x128xf32>
    %cst_5 = arith.constant 0.000000e+00 : f32
    %6 = vector.broadcast %cst_5 : f32 to vector<16x128xf32>
    %7 = arith.maximumf %5, %6 : vector<16x128xf32>
    %c0_6 = arith.constant 0 : index
    %c0_7 = arith.constant 0 : index
    %8 = vector.load %arg4[%c0_6, %c0_7] : memref<128x128xbf16, #tpu.memory_space<vmem>>, vector<128x128xbf16>
    %c0_8 = arith.constant 0 : index
    %c0_9 = arith.constant 0 : index
    %9 = vector.load %arg5[%c0_8, %c0_9] : memref<1x128xf32, #tpu.memory_space<vmem>>, vector<1x128xf32>
    %10 = arith.truncf %7 : vector<16x128xf32> to vector<16x128xbf16>
    %cst_10 = arith.constant dense<0.000000e+00> : vector<16x128xf32>
    %11 = tpu.matmul %10, %8, %cst_10 {dimension_numbers = #tpu.dot_dimension_numbers<[1], [0], [0], [1], [0, 0, 1, 1], [], []>} : vector<16x128xbf16>, vector<128x128xbf16>, vector<16x128xf32> -> vector<16x128xf32>
    %12 = vector.broadcast %9 : vector<1x128xf32> to vector<16x128xf32>
    %13 = arith.addf %11, %12 : vector<16x128xf32>
    %cst_11 = arith.constant 0.000000e+00 : f32
    %14 = vector.broadcast %cst_11 : f32 to vector<16x128xf32>
    %15 = arith.maximumf %13, %14 : vector<16x128xf32>
    %c0_12 = arith.constant 0 : index
    %c0_13 = arith.constant 0 : index
    %16 = vector.load %arg6[%c0_12, %c0_13] : memref<128x128xbf16, #tpu.memory_space<vmem>>, vector<128x128xbf16>
    %c0_14 = arith.constant 0 : index
    %c0_15 = arith.constant 0 : index
    %17 = vector.load %arg7[%c0_14, %c0_15] : memref<1x128xf32, #tpu.memory_space<vmem>>, vector<1x128xf32>
    %18 = arith.truncf %15 : vector<16x128xf32> to vector<16x128xbf16>
    %cst_16 = arith.constant dense<0.000000e+00> : vector<16x128xf32>
    %19 = tpu.matmul %18, %16, %cst_16 {dimension_numbers = #tpu.dot_dimension_numbers<[1], [0], [0], [1], [0, 0, 1, 1], [], []>} : vector<16x128xbf16>, vector<128x128xbf16>, vector<16x128xf32> -> vector<16x128xf32>
    %20 = vector.broadcast %17 : vector<1x128xf32> to vector<16x128xf32>
    %21 = arith.addf %19, %20 : vector<16x128xf32>
    %c0_17 = arith.constant 0 : index
    %c0_18 = arith.constant 0 : index
    %22 = vector.load %arg8[%c0_17, %c0_18] : memref<16x128xf32, #tpu.memory_space<vmem>>, vector<16x128xf32>
    tpu.vector_store %arg8[%c0_17, %c0_18], %21 {strides = array<i32>} : memref<16x128xf32, #tpu.memory_space<vmem>>, vector<16x128xf32>,
    return
  }
  func.func @transform_0(%arg0: i32) -> (i32, i32) {
    %c0_i32 = arith.constant 0 : i32
    %c0_i32_0 = arith.constant 0 : i32
    return %arg0, %c0_i32 : i32, i32
  }
  func.func @transform_1(%arg0: i32) -> (i32, i32) {
    %c0_i32 = arith.constant 0 : i32
    %c0_i32_0 = arith.constant 0 : i32
    %c0_i32_1 = arith.constant 0 : i32
    return %c0_i32, %c0_i32_0 : i32, i32
  }
  func.func @transform_2(%arg0: i32) -> (i32, i32) {
    %c0_i32 = arith.constant 0 : i32
    %c0_i32_0 = arith.constant 0 : i32
    %c0_i32_1 = arith.constant 0 : i32
    return %c0_i32, %c0_i32_0 : i32, i32
  }
  func.func @transform_3(%arg0: i32) -> (i32, i32) {
    %c0_i32 = arith.constant 0 : i32
    %c0_i32_0 = arith.constant 0 : i32
    %c0_i32_1 = arith.constant 0 : i32
    return %c0_i32, %c0_i32_0 : i32, i32
  }
  func.func @transform_4(%arg0: i32) -> (i32, i32) {
    %c0_i32 = arith.constant 0 : i32
    %c0_i32_0 = arith.constant 0 : i32
    %c0_i32_1 = arith.constant 0 : i32
    return %c0_i32, %c0_i32_0 : i32, i32
  }
  func.func @transform_5(%arg0: i32) -> (i32, i32) {
    %c0_i32 = arith.constant 0 : i32
    %c0_i32_0 = arith.constant 0 : i32
    %c0_i32_1 = arith.constant 0 : i32
    return %c0_i32, %c0_i32_0 : i32, i32
  }
  func.func @transform_6(%arg0: i32) -> (i32, i32) {
    %c0_i32 = arith.constant 0 : i32
    %c0_i32_0 = arith.constant 0 : i32
    %c0_i32_1 = arith.constant 0 : i32
    return %c0_i32, %c0_i32_0 : i32, i32
  }
  func.func @transform_7(%arg0: i32) -> (i32, i32) {
    %c0_i32 = arith.constant 0 : i32
    %c0_i32_0 = arith.constant 0 : i32
    return %arg0, %c0_i32 : i32, i32
  }
}

</mosaic_0001>

<bundles_post_ra>
// kernel: fpl_forward.1
= control target key start
LH: loop header
LB: loop body
LE: loop exit
PB: predicated region body
PF: predicated region fallthrough
CT: control target
= control target key end

     0   :  { %v525_v0 = vmov 0.0   ;;  %vm526_vm0 = vmmov 0   ;;  %s687_s1 = inlined_call_operand.vmem [shape: bf16[128,128], index: 1, kind: input, shape index: {}]   ;;  %s688_s3 = inlined_call_operand.vmem [shape: bf16[128,128], index: 3, kind: input, shape index: {}]   ;;  %s689_s0 = inlined_call_operand.vmem [shape: bf16[16,128], index: 0, kind: input, shape index: {}]   ;;  %s690_s5 = inlined_call_operand.vmem [shape: bf16[128,128], index: 5, kind: input, shape index: {}]   ;;  %s691_s2 = inlined_call_operand.vmem [shape: f32[1,128], index: 2, kind: input, shape index: {}]   ;;  %s692_s4 = inlined_call_operand.vmem [shape: f32[1,128], index: 4, kind: input, shape index: {}]   ;;  %s693_s6 = inlined_call_operand.vmem [shape: f32[1,128], index: 6, kind: input, shape index: {}]   ;;  %s694_s7 = inlined_call_operand.vmem [shape: f32[16,128], index: 7, kind: output, shape index: {}]  }
   0x1   :  { %438 = vmatprep.subr.bf16.mxu0 %v525_v0  ;;  %v500_v1 = vld [vmem:[%s687_s1] sm:$0xff]   ;;  %454 = vmatprep.mubr.msk.bf16.mxu0 %vm526_vm0, %v525_v0  ;;  %v501_v2 = vld [vmem:[%s687_s1 + $0x8] sm:$0xff]   ;;  %v502_v3 = vld [vmem:[%s687_s1 + $0x10] sm:$0xff]  }
   0x2   :  { %458 = vmatprep.subr.bf16.mxu1 %v525_v0  ;;  %474 = vmatprep.mubr.msk.bf16.mxu1 %vm526_vm0, %v525_v0  ;;  %v509_v4 = vld [vmem:[%s688_s3] sm:$0xff]   ;;  %v503_v5 = vld [vmem:[%s687_s1 + $0x18] sm:$0xff]   ;;  %v510_v6 = vld [vmem:[%s688_s3 + $0x8] sm:$0xff]  }
   0x3   :  { %439 = vmatpush3.bf16.msra.mxu0 %v500_v1  ;;  %459 = vmatpush3.bf16.msra.mxu1 %v509_v4  ;;  %v504_v7 = vld [vmem:[%s687_s1 + $0x20] sm:$0xff]   ;;  %v511_v8 = vld [vmem:[%s688_s3 + $0x10] sm:$0xff]   ;;  %v505_v9 = vld [vmem:[%s687_s1 + $0x28] sm:$0xff]  }
   0x4   :  { %440 = vmatprep.subr.bf16.mxu0 %v525_v0  ;;  %460 = vmatprep.subr.bf16.mxu1 %v525_v0  ;;  %v512_v10 = vld [vmem:[%s688_s3 + $0x18] sm:$0xff]   ;;  %v506_v11 = vld [vmem:[%s687_s1 + $0x30] sm:$0xff]   ;;  %v513_v12 = vld [vmem:[%s688_s3 + $0x20] sm:$0xff]  }
   0x5   :  { %v507_v13 = vld [vmem:[%s687_s1 + $0x38] sm:$0xff]   ;;  %v514_v14 = vld [vmem:[%s688_s3 + $0x28] sm:$0xff]   ;;  %v508_v15 = vld [vmem:[%s689_s0] sm:$0xff]  }
   0x6   :  { %v515_v16 = vld [vmem:[%s688_s3 + $0x30] sm:$0xff]   ;;  %v516_v17 = vld [vmem:[%s688_s3 + $0x38] sm:$0xff]   ;;  %v517_v18 = vld [vmem:[%s690_s5] sm:$0xff]  }
   0x7   :  { %441 = vmatpush3.bf16.msra.mxu0 %v501_v2  ;;  %461 = vmatpush3.bf16.msra.mxu1 %v510_v6  ;;  %v518_v19 = vld [vmem:[%s690_s5 + $0x8] sm:$0xff]   ;;  %v519_v20 = vld [vmem:[%s690_s5 + $0x10] sm:$0xff]   ;;  %v520_v21 = vld [vmem:[%s690_s5 + $0x18] sm:$0xff]  }
   0x8   :  { %442 = vmatprep.subr.bf16.mxu0 %v525_v0  ;;  %462 = vmatprep.subr.bf16.mxu1 %v525_v0  ;;  %v521_v22 = vld [vmem:[%s690_s5 + $0x20] sm:$0xff]   ;;  %v522_v23 = vld [vmem:[%s690_s5 + $0x28] sm:$0xff]   ;;  %v523_v34 = vld [vmem:[%s690_s5 + $0x30] sm:$0xff]  }
   0x9   :  { %v383_v24 = vld [vmem:[%s691_s2] ss:$0 sm:$0xff]  ;;  %v524_v35 = vld [vmem:[%s690_s5 + $0x38] sm:$0xff]  }
   0xa   :  { %v393_v36 = vld [vmem:[%s692_s4] ss:$0 sm:$0xff] }
   0xb   :  { %443 = vmatpush3.bf16.msra.mxu0 %v502_v3  ;;  %463 = vmatpush3.bf16.msra.mxu1 %v511_v8  ;;  %v402_v46 = vld [vmem:[%s693_s6] ss:$0 sm:$0xff] }
   0xc   :  { %444 = vmatprep.subr.bf16.mxu0 %v525_v0  ;;  %464 = vmatprep.subr.bf16.mxu1 %v525_v0 }
   0xf   :  { %445 = vmatpush3.bf16.msra.mxu0 %v503_v5  ;;  %465 = vmatpush3.bf16.msra.mxu1 %v512_v10 }
  0x10   :  { %446 = vmatprep.subr.bf16.mxu0 %v525_v0  ;;  %466 = vmatprep.subr.bf16.mxu1 %v525_v0 }
  0x13   :  { %447 = vmatpush3.bf16.msra.mxu0 %v504_v7  ;;  %467 = vmatpush3.bf16.msra.mxu1 %v513_v12 }
  0x14   :  { %448 = vmatprep.subr.bf16.mxu0 %v525_v0  ;;  %468 = vmatprep.subr.bf16.mxu1 %v525_v0 }
  0x17   :  { %449 = vmatpush3.bf16.msra.mxu0 %v505_v9  ;;  %469 = vmatpush3.bf16.msra.mxu1 %v514_v14 }
  0x18   :  { %450 = vmatprep.subr.bf16.mxu0 %v525_v0  ;;  %470 = vmatprep.subr.bf16.mxu1 %v525_v0 }
  0x1b   :  { %451 = vmatpush3.bf16.msra.mxu0 %v506_v11  ;;  %471 = vmatpush3.bf16.msra.mxu1 %v515_v16 }
  0x1c   :  { %452 = vmatprep.subr.bf16.mxu0 %v525_v0  ;;  %472 = vmatprep.subr.bf16.mxu1 %v525_v0 }
  0x1f   :  { %453 = vmatpush3.bf16.msra.mxu0 %v507_v13  ;;  %473 = vmatpush3.bf16.msra.mxu1 %v516_v17 }
  0x20   :  { %478 = vmatprep.subr.bf16.mxu0 %v525_v0 }
  0x22   :  { %455 = vmatmul.mubr.bf16.vlgmr.msra.gmra.mrb[0].mxu0 %v508_v15 }
  0x23   :  { %494 = vmatprep.mubr.msk.bf16.mxu0 %vm526_vm0, %v525_v0  ;;  %479 = vmatpush3.bf16.msra.mxu0 %v517_v18 }
  0x24   :  { %480 = vmatprep.subr.bf16.mxu0 %v525_v0 }
  0x27   :  { %481 = vmatpush3.bf16.msra.mxu0 %v518_v19 }
  0x28   :  { %482 = vmatprep.subr.bf16.mxu0 %v525_v0 }
  0x2b   :  { %483 = vmatpush3.bf16.msra.mxu0 %v519_v20 }
  0x2c   :  { %484 = vmatprep.subr.bf16.mxu0 %v525_v0 }
  0x2f   :  { %485 = vmatpush3.bf16.msra.mxu0 %v520_v21 }
  0x30   :  { %486 = vmatprep.subr.bf16.mxu0 %v525_v0 }
  0x33   :  { %487 = vmatpush3.bf16.msra.mxu0 %v521_v22 }
  0x34   :  { %488 = vmatprep.subr.bf16.mxu0 %v525_v0 }
  0x37   :  { %489 = vmatpush3.bf16.msra.mxu0 %v522_v23 }
  0x38   :  { %490 = vmatprep.subr.bf16.mxu0 %v525_v0 }
  0x3b   :  { %491 = vmatpush3.bf16.msra.mxu0 %v523_v34 }
  0x3c   :  { %492 = vmatprep.subr.bf16.mxu0 %v525_v0 }
  0x3f   :  { %493 = vmatpush3.bf16.msra.mxu0 %v524_v35 }
  0xf5   :  { %v140_v25 = vpop.f32.mrb[0].mxu0 }
  0xf6   :  { %v141_v26 = vadd.f32 %v383_v24, %v140_v25  ;;  %v456_v27 = vpop.f32.mrb[1].mxu0 }
  0xf7   :  { %v143_v28 = vpop.f32.mrb[2].mxu0 }
  0xf8   :  { %v144_v29 = vadd.f32 %v383_v24, %v143_v28  ;;  %v457_v30 = vpop.f32.mrb[3].mxu0  ;;  %v147_v31 = vmax.f32 %v141_v26, 0.0 }
  0xfa   :  { %v148_v32 = vmax.f32 %v144_v29, 0.0 }
  0xfc   :  { %v166_v33 = vpack.c.bf16 %v148_v32, %v147_v31 }
  0xfe   :  { %475 = vmatmul.mubr.bf16.vlgmr.msra.gmra.mrb[0].mxu1 %v166_v33 }
 0x1d1   :  { %v255_v37 = vpop.f32.mrb[0].mxu1 }
 0x1d2   :  { %v256_v38 = vadd.f32 %v393_v36, %v255_v37  ;;  %v476_v39 = vpop.f32.mrb[1].mxu1 }
 0x1d3   :  { %v258_v40 = vpop.f32.mrb[2].mxu1 }
 0x1d4   :  { %v259_v41 = vadd.f32 %v393_v36, %v258_v40  ;;  %v477_v42 = vpop.f32.mrb[3].mxu1  ;;  %v262_v43 = vmax.f32 %v256_v38, 0.0 }
 0x1d6   :  { %v263_v44 = vmax.f32 %v259_v41, 0.0 }
 0x1d8   :  { %v281_v45 = vpack.c.bf16 %v263_v44, %v262_v43 }
 0x1da   :  { %495 = vmatmul.mubr.bf16.vlgmr.msra.gmra.mrb[4].mxu0 %v281_v45 }
 0x2ad   :  { %v370_v47 = vpop.f32.mrb[4].mxu0 }
 0x2ae   :  { %v371_v48 = vadd.f32 %v402_v46, %v370_v47  ;;  %v496_v49 = vpop.f32.mrb[5].mxu0 }
 0x2af   :  { %v373_v50 = vpop.f32.mrb[6].mxu0 }
 0x2b0   :  { %377 = vst [vmem:[%s694_s7] sm:$0xff] %v371_v48  ;;  %v374_v51 = vadd.f32 %v402_v46, %v373_v50  ;;  %v497_v52 = vpop.f32.mrb[7].mxu0 }
 0x2b2   :  { %378 = vst [vmem:[%s694_s7 + $0x8] sm:$0xff] %v374_v51 }

</bundles_post_ra>
